<compile_context>
chip_gen: v6e
topology: v6e:2x2x1
jax: 0.10.0
libtpu: 0.0.40
codegen_flags: <defaults>
</compile_context>

<pallas_src>
import jax
import jax.numpy as jnp
from jax.experimental import pallas as pl
from jax.experimental.pallas import tpu as pltpu


def _spe_fc_kernel(x_ref, w_ref, b_ref, o_ref):
    """Fused Spe_FC block.

    x_ref: (T, hw_tile, C)   w_ref: (T, C, T*C)   b_ref: (1, T*C)
    o_ref: (hw_tile, T*C)
    """
    t_dim = x_ref.shape[0]
    acc = jnp.zeros(o_ref.shape, dtype=jnp.float32)
    # Static unroll over the (small) band dimension: T dense 2-D MXU matmuls.
    for t in range(t_dim):
        acc = acc + jnp.dot(x_ref[t], w_ref[t],
                            preferred_element_type=jnp.float32)
    o_ref[...] = (acc + b_ref[...]).astype(o_ref.dtype)


def prepare_spe_fc_params(w_t, w_proj, b_proj, *, band, segment_dim, b_t=None):
    """One-time folding of (permute -> mlp_t -> inverse permute -> proj).

    w_t:    (band*S, band*S)  mlp_t weight, PyTorch (out, in) layout
    w_proj: (C, C)            proj weight, PyTorch (out, in) layout
    b_proj: (C,)              proj bias
    b_t:    optional (band*S,) mlp_t bias (module default qkv_bias=False)

    Returns {"w_comb": (T, C, T*C), "b_comb": (1, T*C)} such that
      y[b, t', hw, c'] = sum_{t,c} x[b, t, hw, c] * w_comb[t, c, t'*C + c']
                         + b_comb[0, t'*C + c']
    """
    T = band
    C = w_proj.shape[0]
    G = segment_dim
    S = C // G
    wt4 = w_t.reshape(T, S, T, S)        # [t_out, s_out, t_in, s_in]
    wp3 = w_proj.reshape(C, G, S)        # [c_out, g, s'(=mlp_t out sub-index)]
    # M[t_in, g, s_in, t_out, c_out] = sum_{s'} wt4[t_out, s', t_in, s_in]
    #                                           * wp3[c_out, g, s']
    m = jnp.einsum("uptq,cgp->tgquc", wt4, wp3)
    w_comb = m.reshape(T, C, T * C).astype(jnp.float32)

    b_comb = jnp.tile(b_proj, T)                       # index = t'*C + c'
    if b_t is not None:
        b_comb = b_comb + jnp.einsum(
            "cgp,up->uc", wp3, b_t.reshape(T, S)).reshape(T * C)
    b_comb = b_comb.reshape(1, T * C).astype(jnp.float32)
    return {"w_comb": w_comb, "b_comb": b_comb}


def _pick_hw_tile(hw, t, c, itemsize, budget_bytes=8 * 1024 * 1024):
    """Largest divisor of hw (multiple of 8, or hw itself) whose double-buffered
    x and output blocks stay under the VMEM budget."""
    def blocks_bytes(tile):
        return 2 * (t * tile * c + tile * t * c) * itemsize
    if blocks_bytes(hw) <= budget_bytes:
        return hw
    cand = (hw // 8) * 8
    while cand >= 8:
        if hw % cand == 0 and blocks_bytes(cand) <= budget_bytes:
            return cand
        cand -= 8
    return hw        # fallback: one full-HW block (correct, may be large)


def spe_fc_forward(x, prepared):
    """Pallas-backed Spe_FC forward. x: (B, T, H, W, C). proj_drop(p=0)=id."""
    B, T, H, W, C = x.shape
    HW = H * W
    TC = T * C
    w_comb = prepared["w_comb"]          # (T, C, T*C)
    b_comb = prepared["b_comb"]          # (1, T*C)

    x_v = x.reshape(B, T, HW, C)         # contiguous view, no data movement
    itemsize = jnp.dtype(x.dtype).itemsize
    hw_tile = _pick_hw_tile(HW, T, C, itemsize)
    grid = (B, HW // hw_tile)

    flops = 2 * B * HW * TC * TC
    bytes_accessed = (itemsize * (B * T * HW * C + B * HW * TC)
                      + 4 * (T * C * TC + TC))

    y = pl.pallas_call(
        _spe_fc_kernel,
        out_shape=jax.ShapeDtypeStruct((B, HW, TC), x.dtype),
        grid_spec=pltpu.PrefetchScalarGridSpec(
            num_scalar_prefetch=0,
            grid=grid,
            in_specs=[
                # activation tile: lane dim = full C, sublane = hw_tile
                pl.BlockSpec((None, T, hw_tile, C), lambda b, j: (b, 0, j, 0)),
                # folded weight: resident across the whole grid
                pl.BlockSpec((T, C, TC), lambda b, j: (0, 0, 0)),
                # folded bias: resident
                pl.BlockSpec((1, TC), lambda b, j: (0, 0)),
            ],
            # lane-dense output block (T*C lanes)
            out_specs=pl.BlockSpec((None, hw_tile, TC), lambda b, j: (b, j, 0)),
        ),
        compiler_params=pltpu.CompilerParams(
            dimension_semantics=("parallel", "parallel"),
            vmem_limit_bytes=32 * 1024 * 1024,
        ),
        cost_estimate=pl.CostEstimate(
            flops=flops, transcendentals=0, bytes_accessed=bytes_accessed),
    )(x_v, w_comb, b_comb)

    # Final relayout (B, H*W, T*C) -> (B, T, H, W, C): one small transpose of
    # the already-final output, intentionally left to XLA (an in-kernel
    # regroup would require lane-dim reshapes).
    y = y.reshape(B, H, W, T, C)
    return jnp.transpose(y, (0, 3, 1, 2, 4))


def reference_forward(x, w_t, w_proj, b_proj, segment_dim, b_t=None):
    """Pure-JAX reference mirroring the PyTorch forward."""
    B, T, H, W, C = x.shape
    S = C // segment_dim
    t = x.reshape(B, T, H, W, segment_dim, S)
    t = jnp.transpose(t, (0, 4, 2, 3, 1, 5)).reshape(B, segment_dim, H, W, T * S)
    t = t @ w_t.T
    if b_t is not None:
        t = t + b_t
    t = t.reshape(B, segment_dim, H, W, T, S)
    t = jnp.transpose(t, (0, 4, 2, 3, 1, 5)).reshape(B, T, H, W, C)
    return t @ w_proj.T + b_proj


if __name__ == "__main__":
    # Module hyper-params: dim == C, band == T, constructor "C" == S = C // segment_dim
    B, T, H, W = 2, 8, 4, 4
    segment_dim = 4
    C = 16                       # dim
    S = C // segment_dim         # 4
    dim2 = T * S                 # 32 == band * S

    key = jax.random.PRNGKey(0)
    kx, kw1, kw2, kb2 = jax.random.split(key, 4)

    x = jax.random.normal(kx, (B, T, H, W, C), dtype=jnp.float32)
    w_t = 0.05 * jax.random.normal(kw1, (dim2, dim2), dtype=jnp.float32)   # mlp_t (bias=False)
    w_proj = 0.05 * jax.random.normal(kw2, (C, C), dtype=jnp.float32)      # proj weight
    b_proj = 0.01 * jax.random.normal(kb2, (C,), dtype=jnp.float32)        # proj bias

    # One-time weight folding (lives at param-init time, NOT in the hot path).
    prepared = prepare_spe_fc_params(w_t, w_proj, b_proj,
                                     band=T, segment_dim=segment_dim)
    prepared = jax.tree_util.tree_map(jax.block_until_ready, prepared)

    fwd = jax.jit(spe_fc_forward)
    out = jax.block_until_ready(fwd(x, prepared))

    ref = reference_forward(x, w_t, w_proj, b_proj, segment_dim)
    assert out.shape == (B, T, H, W, C)
    assert jnp.allclose(out, ref, atol=1e-4, rtol=1e-4), \
        float(jnp.max(jnp.abs(out - ref)))

    print("KERNEL_OK")
</pallas_src>

<mosaic_0001>
module attributes {stable_mosaic.version = 11 : i64} {
  func.func @_spe_fc_kernel(%arg0: i32, %arg1: i32, %arg2: memref<1x8x16x16xf32, #tpu.memory_space<vmem>>, %arg3: memref<8x16x128xf32, #tpu.memory_space<vmem>>, %arg4: memref<1x128xf32, #tpu.memory_space<vmem>>, %arg5: memref<1x16x128xf32, #tpu.memory_space<vmem>>) attributes {dimension_semantics = [#tpu.dimension_semantics<parallel>, #tpu.dimension_semantics<parallel>], iteration_bounds = array<i64: 2, 1>, scalar_prefetch = 0 : i64, scratch_operands = 0 : i64, tpu.core_type = #tpu.core_type<tc>, window_params = [{transform_indices = @transform_0, window_bounds = array<i64: 1, 8, 16, 16>}, {pipeline_mode = #tpu.pipeline_mode<synchronous>, transform_indices = @transform_1, window_bounds = array<i64: 8, 16, 128>}, {pipeline_mode = #tpu.pipeline_mode<synchronous>, transform_indices = @transform_2, window_bounds = array<i64: 1, 128>}, {transform_indices = @transform_3, window_bounds = array<i64: 1, 16, 128>}]} {
    %cst = arith.constant 0.000000e+00 : f32
    %0 = vector.broadcast %cst : f32 to vector<16x128xf32>
    %c0 = arith.constant 0 : index
    %c0_0 = arith.constant 0 : index
    %c0_1 = arith.constant 0 : index
    %c0_2 = arith.constant 0 : index
    %1 = vector.load %arg2[%c0, %c0_0, %c0_1, %c0_2] : memref<1x8x16x16xf32, #tpu.memory_space<vmem>>, vector<1x1x16x16xf32>
    %2 = vector.shape_cast %1 : vector<1x1x16x16xf32> to vector<16x16xf32>
    %c0_3 = arith.constant 0 : index
    %c0_4 = arith.constant 0 : index
    %c0_5 = arith.constant 0 : index
    %3 = vector.load %arg3[%c0_3, %c0_4, %c0_5] : memref<8x16x128xf32, #tpu.memory_space<vmem>>, vector<1x16x128xf32>
    %4 = vector.shape_cast %3 : vector<1x16x128xf32> to vector<16x128xf32>
    %cst_6 = arith.constant dense<0.000000e+00> : vector<16x128xf32>
    %5 = tpu.matmul %2, %4, %cst_6 {dimension_numbers = #tpu.dot_dimension_numbers<[1], [0], [0], [1], [0, 0, 1, 1], [], []>} : vector<16x16xf32>, vector<16x128xf32>, vector<16x128xf32> -> vector<16x128xf32>
    %6 = arith.addf %0, %5 : vector<16x128xf32>
    %c0_7 = arith.constant 0 : index
    %c1 = arith.constant 1 : index
    %c0_8 = arith.constant 0 : index
    %c0_9 = arith.constant 0 : index
    %7 = vector.load %arg2[%c0_7, %c1, %c0_8, %c0_9] : memref<1x8x16x16xf32, #tpu.memory_space<vmem>>, vector<1x1x16x16xf32>
    %8 = vector.shape_cast %7 : vector<1x1x16x16xf32> to vector<16x16xf32>
    %c1_10 = arith.constant 1 : index
    %c0_11 = arith.constant 0 : index
    %c0_12 = arith.constant 0 : index
    %9 = vector.load %arg3[%c1_10, %c0_11, %c0_12] : memref<8x16x128xf32, #tpu.memory_space<vmem>>, vector<1x16x128xf32>
    %10 = vector.shape_cast %9 : vector<1x16x128xf32> to vector<16x128xf32>
    %cst_13 = arith.constant dense<0.000000e+00> : vector<16x128xf32>
    %11 = tpu.matmul %8, %10, %cst_13 {dimension_numbers = #tpu.dot_dimension_numbers<[1], [0], [0], [1], [0, 0, 1, 1], [], []>} : vector<16x16xf32>, vector<16x128xf32>, vector<16x128xf32> -> vector<16x128xf32>
    %12 = arith.addf %6, %11 : vector<16x128xf32>
    %c0_14 = arith.constant 0 : index
    %c2 = arith.constant 2 : index
    %c0_15 = arith.constant 0 : index
    %c0_16 = arith.constant 0 : index
    %13 = vector.load %arg2[%c0_14, %c2, %c0_15, %c0_16] : memref<1x8x16x16xf32, #tpu.memory_space<vmem>>, vector<1x1x16x16xf32>
    %14 = vector.shape_cast %13 : vector<1x1x16x16xf32> to vector<16x16xf32>
    %c2_17 = arith.constant 2 : index
    %c0_18 = arith.constant 0 : index
    %c0_19 = arith.constant 0 : index
    %15 = vector.load %arg3[%c2_17, %c0_18, %c0_19] : memref<8x16x128xf32, #tpu.memory_space<vmem>>, vector<1x16x128xf32>
    %16 = vector.shape_cast %15 : vector<1x16x128xf32> to vector<16x128xf32>
    %cst_20 = arith.constant dense<0.000000e+00> : vector<16x128xf32>
    %17 = tpu.matmul %14, %16, %cst_20 {dimension_numbers = #tpu.dot_dimension_numbers<[1], [0], [0], [1], [0, 0, 1, 1], [], []>} : vector<16x16xf32>, vector<16x128xf32>, vector<16x128xf32> -> vector<16x128xf32>
    %18 = arith.addf %12, %17 : vector<16x128xf32>
    %c0_21 = arith.constant 0 : index
    %c3 = arith.constant 3 : index
    %c0_22 = arith.constant 0 : index
    %c0_23 = arith.constant 0 : index
    %19 = vector.load %arg2[%c0_21, %c3, %c0_22, %c0_23] : memref<1x8x16x16xf32, #tpu.memory_space<vmem>>, vector<1x1x16x16xf32>
    %20 = vector.shape_cast %19 : vector<1x1x16x16xf32> to vector<16x16xf32>
    %c3_24 = arith.constant 3 : index
    %c0_25 = arith.constant 0 : index
    %c0_26 = arith.constant 0 : index
    %21 = vector.load %arg3[%c3_24, %c0_25, %c0_26] : memref<8x16x128xf32, #tpu.memory_space<vmem>>, vector<1x16x128xf32>
    %22 = vector.shape_cast %21 : vector<1x16x128xf32> to vector<16x128xf32>
    %cst_27 = arith.constant dense<0.000000e+00> : vector<16x128xf32>
    %23 = tpu.matmul %20, %22, %cst_27 {dimension_numbers = #tpu.dot_dimension_numbers<[1], [0], [0], [1], [0, 0, 1, 1], [], []>} : vector<16x16xf32>, vector<16x128xf32>, vector<16x128xf32> -> vector<16x128xf32>
    %24 = arith.addf %18, %23 : vector<16x128xf32>
    %c0_28 = arith.constant 0 : index
    %c4 = arith.constant 4 : index
    %c0_29 = arith.constant 0 : index
    %c0_30 = arith.constant 0 : index
    %25 = vector.load %arg2[%c0_28, %c4, %c0_29, %c0_30] : memref<1x8x16x16xf32, #tpu.memory_space<vmem>>, vector<1x1x16x16xf32>
    %26 = vector.shape_cast %25 : vector<1x1x16x16xf32> to vector<16x16xf32>
    %c4_31 = arith.constant 4 : index
    %c0_32 = arith.constant 0 : index
    %c0_33 = arith.constant 0 : index
    %27 = vector.load %arg3[%c4_31, %c0_32, %c0_33] : memref<8x16x128xf32, #tpu.memory_space<vmem>>, vector<1x16x128xf32>
    %28 = vector.shape_cast %27 : vector<1x16x128xf32> to vector<16x128xf32>
    %cst_34 = arith.constant dense<0.000000e+00> : vector<16x128xf32>
    %29 = tpu.matmul %26, %28, %cst_34 {dimension_numbers = #tpu.dot_dimension_numbers<[1], [0], [0], [1], [0, 0, 1, 1], [], []>} : vector<16x16xf32>, vector<16x128xf32>, vector<16x128xf32> -> vector<16x128xf32>
    %30 = arith.addf %24, %29 : vector<16x128xf32>
    %c0_35 = arith.constant 0 : index
    %c5 = arith.constant 5 : index
    %c0_36 = arith.constant 0 : index
    %c0_37 = arith.constant 0 : index
    %31 = vector.load %arg2[%c0_35, %c5, %c0_36, %c0_37] : memref<1x8x16x16xf32, #tpu.memory_space<vmem>>, vector<1x1x16x16xf32>
    %32 = vector.shape_cast %31 : vector<1x1x16x16xf32> to vector<16x16xf32>
    %c5_38 = arith.constant 5 : index
    %c0_39 = arith.constant 0 : index
    %c0_40 = arith.constant 0 : index
    %33 = vector.load %arg3[%c5_38, %c0_39, %c0_40] : memref<8x16x128xf32, #tpu.memory_space<vmem>>, vector<1x16x128xf32>
    %34 = vector.shape_cast %33 : vector<1x16x128xf32> to vector<16x128xf32>
    %cst_41 = arith.constant dense<0.000000e+00> : vector<16x128xf32>
    %35 = tpu.matmul %32, %34, %cst_41 {dimension_numbers = #tpu.dot_dimension_numbers<[1], [0], [0], [1], [0, 0, 1, 1], [], []>} : vector<16x16xf32>, vector<16x128xf32>, vector<16x128xf32> -> vector<16x128xf32>
    %36 = arith.addf %30, %35 : vector<16x128xf32>
    %c0_42 = arith.constant 0 : index
    %c6 = arith.constant 6 : index
    %c0_43 = arith.constant 0 : index
    %c0_44 = arith.constant 0 : index
    %37 = vector.load %arg2[%c0_42, %c6, %c0_43, %c0_44] : memref<1x8x16x16xf32, #tpu.memory_space<vmem>>, vector<1x1x16x16xf32>
    %38 = vector.shape_cast %37 : vector<1x1x16x16xf32> to vector<16x16xf32>
    %c6_45 = arith.constant 6 : index
    %c0_46 = arith.constant 0 : index
    %c0_47 = arith.constant 0 : index
    %39 = vector.load %arg3[%c6_45, %c0_46, %c0_47] : memref<8x16x128xf32, #tpu.memory_space<vmem>>, vector<1x16x128xf32>
    %40 = vector.shape_cast %39 : vector<1x16x128xf32> to vector<16x128xf32>
    %cst_48 = arith.constant dense<0.000000e+00> : vector<16x128xf32>
    %41 = tpu.matmul %38, %40, %cst_48 {dimension_numbers = #tpu.dot_dimension_numbers<[1], [0], [0], [1], [0, 0, 1, 1], [], []>} : vector<16x16xf32>, vector<16x128xf32>, vector<16x128xf32> -> vector<16x128xf32>
    %42 = arith.addf %36, %41 : vector<16x128xf32>
    %c0_49 = arith.constant 0 : index
    %c7 = arith.constant 7 : index
    %c0_50 = arith.constant 0 : index
    %c0_51 = arith.constant 0 : index
    %43 = vector.load %arg2[%c0_49, %c7, %c0_50, %c0_51] : memref<1x8x16x16xf32, #tpu.memory_space<vmem>>, vector<1x1x16x16xf32>
    %44 = vector.shape_cast %43 : vector<1x1x16x16xf32> to vector<16x16xf32>
    %c7_52 = arith.constant 7 : index
    %c0_53 = arith.constant 0 : index
    %c0_54 = arith.constant 0 : index
    %45 = vector.load %arg3[%c7_52, %c0_53, %c0_54] : memref<8x16x128xf32, #tpu.memory_space<vmem>>, vector<1x16x128xf32>
    %46 = vector.shape_cast %45 : vector<1x16x128xf32> to vector<16x128xf32>
    %cst_55 = arith.constant dense<0.000000e+00> : vector<16x128xf32>
    %47 = tpu.matmul %44, %46, %cst_55 {dimension_numbers = #tpu.dot_dimension_numbers<[1], [0], [0], [1], [0, 0, 1, 1], [], []>} : vector<16x16xf32>, vector<16x128xf32>, vector<16x128xf32> -> vector<16x128xf32>
    %48 = arith.addf %42, %47 : vector<16x128xf32>
    %c0_56 = arith.constant 0 : index
    %c0_57 = arith.constant 0 : index
    %49 = vector.load %arg4[%c0_56, %c0_57] : memref<1x128xf32, #tpu.memory_space<vmem>>, vector<1x128xf32>
    %50 = vector.broadcast %49 : vector<1x128xf32> to vector<16x128xf32>
    %51 = arith.addf %48, %50 : vector<16x128xf32>
    %c0_58 = arith.constant 0 : index
    %c0_59 = arith.constant 0 : index
    %c0_60 = arith.constant 0 : index
    %52 = vector.load %arg5[%c0_58, %c0_59, %c0_60] : memref<1x16x128xf32, #tpu.memory_space<vmem>>, vector<1x16x128xf32>
    %53 = vector.shape_cast %52 : vector<1x16x128xf32> to vector<16x128xf32>
    %54 = vector.shape_cast %51 : vector<16x128xf32> to vector<1x16x128xf32>
    tpu.vector_store %arg5[%c0_58, %c0_59, %c0_60], %54 {strides = array<i32>} : memref<1x16x128xf32, #tpu.memory_space<vmem>>, vector<1x16x128xf32>,
    return
  }
  func.func @transform_0(%arg0: i32, %arg1: i32) -> (i32, i32, i32, i32) {
    %c0_i32 = arith.constant 0 : i32
    %c0_i32_0 = arith.constant 0 : i32
    %c0_i32_1 = arith.constant 0 : i32
    return %arg0, %c0_i32, %arg1, %c0_i32_0 : i32, i32, i32, i32
  }
  func.func @transform_1(%arg0: i32, %arg1: i32) -> (i32, i32, i32) {
    %c0_i32 = arith.constant 0 : i32
    %c0_i32_0 = arith.constant 0 : i32
    %c0_i32_1 = arith.constant 0 : i32
    %c0_i32_2 = arith.constant 0 : i32
    return %c0_i32, %c0_i32_0, %c0_i32_1 : i32, i32, i32
  }
  func.func @transform_2(%arg0: i32, %arg1: i32) -> (i32, i32) {
    %c0_i32 = arith.constant 0 : i32
    %c0_i32_0 = arith.constant 0 : i32
    %c0_i32_1 = arith.constant 0 : i32
    return %c0_i32, %c0_i32_0 : i32, i32
  }
  func.func @transform_3(%arg0: i32, %arg1: i32) -> (i32, i32, i32) {
    %c0_i32 = arith.constant 0 : i32
    %c0_i32_0 = arith.constant 0 : i32
    return %arg0, %arg1, %c0_i32 : i32, i32, i32
  }
}

</mosaic_0001>

<bundles_post_ra>
// kernel: spe_fc_forward.1
= control target key start
LH: loop header
LB: loop body
LE: loop exit
PB: predicated region body
PF: predicated region fallthrough
CT: control target
= control target key end

     0   :  { %8 = vsyncpa [#allocation3], 0  ;;  %s1559_s0 = inlined_call_operand.hbm [shape: f32[2,8,16,16], index: 0, kind: input, shape index: {}]   ;;  %s1560_s1 = inlined_call_operand.hbm [shape: f32[8,16,128], index: 1, kind: input, shape index: {}]   ;;  %s1561_s2 = inlined_call_operand.vmem [shape: f32[1,128], index: 2, kind: input, shape index: {}]   ;;  %s1562_s3 = inlined_call_operand.vmem [shape: f32[2,16,128], index: 3, kind: output, shape index: {}]  }
   0x1   :  { %10 = vsyncpa [#allocation3 + $0x1], 0 }
   0x2   :  { %11 = vsyncpa [#allocation5], 0  ;;  %s1395_s12 = smov 0   ;;  %s1397_s13 = smov 0  }
   0x3   :  { %s1399_s14 = smov 0   ;;  %s1401_s15 = smov 0  }
   0x4   :  { %s1403_s16 = smov 0   ;;  %s1405_s17 = smov 0  }
   0x5 LB: > { %s1057_s18 = sadd.s32 4294967295, %s1369_s17   ;;  %p51_p0 = scmp.ne.s32.totalorder %s1353_s13, %s1349_s12  ;;  %s1369_s17 = sphi %s1405_s17, %s17_s17   ;;  %s1365_s16 = sphi %s1403_s16, %s1572_s16   ;;  %s1361_s15 = sphi %s1401_s15, %s1571_s15   ;;  %s1357_s14 = sphi %s1399_s14, %s1570_s14   ;;  %s1353_s13 = sphi %s1397_s13, %s1569_s13   ;;  %s1349_s12 = sphi %s1395_s12, %s1568_s12  }
   0x6   : > { %p1425_p1 = scmp.eq.s32.totalorder %s1057_s18, 0  ;;  %p1059_p2 = scmp.ge.s32.totalorder %s1369_s17, 1 }
   0x7   : > { %p132_p3 = scmp.lt.s32.totalorder %s1369_s17, 3  ;;  %s1371_s22 = smov [#allocation4]  }
   0x8   : > { %p1433_p4 = por %p1425_p1, %p51_p0  ;;  %s144_s23 = sshll.u32 %s1371_s22, 4  ;;  %s145_s23 = int_to_ptr.vmem [resolvable:$true] %s144_s23 }
   0x9   : > { %p1437_p5 = pnand %p1059_p2, %p132_p3  ;;  %s29_s25 = sadd.s32 1, %s1365_s16 }
   0xa   : > { %s1272_s26 = scalar_lea.vmem %s145_s23, 2048  ;;  %p1280_p12 = scmp.lt.s32.totalorder %s145_s23, %s145_s23 }
   0xb   : > { %p1199_p6 = pneg %p1437_p5  ;;  %p1273_p9 = scmp.ne.s32.totalorder %s145_s23, %s1272_s26 }
   0xc   : > { %p1281_p13 = scmp.lt.s32.totalorder %s1272_s26, %s1272_s26 }
   0xd   : > { %p1445_p7 = pnand %p1199_p6, %p1425_p1 }
   0xe   : > { %p1282_p0 = por %p1281_p13, %p1280_p12 }
   0xf   : > { %p1263_p8 = pneg %p1445_p7 }
  0x11   : > { %p1275_p10 = pnand %p1273_p9, %p1263_p8 }
  0x13   : > { %p1276_p11 = pneg %p1275_p10 }
  0x15   : > { %p1283_p2 = pnand %p1282_p0, %p1276_p11 }
  0x17   : > { %1286 = shalt.err (!%p1283_p2)
}
  0x18   : > { %s1372_s27 = smov 128   ;;  %s1373_s28 = smov 8  }
  0x19   : > { %1202 = dma.hbm_to_vmem [thread:$0]  (!%p1445_p7), %s1560_s1, 2048, %s145_s23, [#allocation5], %s1372_s27, %s1372_s27, %s1373_s28  }
  0x1a   : > { %p31_p3 = scmp.ge.s32.totalorder %s29_s25, 2  ;;  %s38_s4 = sadd.s32 1, %s1357_s14 }
  0x1b   : > { %p45_p6 = scmp.ne.s32.totalorder %s1357_s14, %s1353_s13  ;;  %p46_p8 = scmp.eq.s32.totalorder %s1369_s17, 0 }
  0x1c   : > { %s1574_s25 = smov (%p31_p3, %s29_s25), 0  ;;  %p1208_p10 = scmp.lt.s32.totalorder %s1369_s17, 2 }
  0x1d   : > { %p47_p9 = por %p46_p8, %p45_p6  ;;  %s33_s5 = ssub.s32 %s1365_s16, %s1574_s25 }
  0x1e   : > { %s161_s6 = sand.u32 1, %s1357_s14   ;;  %p36_p11 = scmp.eq.s32.totalorder %s33_s5, 0 }
  0x1f   : > { %s1062_s7 = sshll.u32 %s161_s6, 7  ;;  %s1103_s8 = sshll.u32 %s1365_s16, 11 }
  0x20   : > { %s1472_s9 = scalar_select %p36_p11, %s1357_s14, %s38_s4  }
  0x21   : > { %s173_s12 = scalar_lea.hbm %s1559_s0, %s1103_s8  ;;  %s165_s18 = scalar_lea.vmem [#allocation2], %s1062_s7 }
  0x22   : > { %s174_s22 = sshll.u32 %s165_s18, 4  ;;  %p1477_p7 = pnand %p1208_p10, %p47_p9  ;;  %s175_s22 = int_to_ptr.vmem [resolvable:$true] %s174_s22 }
  0x23   : > { %s162_s24 = scalar_lea.sflag [#allocation3], %s161_s6  ;;  %s1300_s26 = scalar_lea.vmem %s175_s22, 2048 }
  0x24   : > { %p1289_p12 = pneg %p1477_p7  ;;  %p1301_p13 = scmp.ne.s32.totalorder %s175_s22, %s1300_s26 }
  0x25   : > { %s1374_s29 = smov [#allocation2]  }
  0x26   : > { %p1303_p0 = pnand %p1301_p13, %p1289_p12  ;;  %s1305_s30 = sshll.u32 %s1374_s29, 4  ;;  %s1306_s30 = int_to_ptr.vmem [resolvable:$false] %s1305_s30 }
  0x27   : > { %s1307_s4 = scalar_lea.vmem %s1306_s30, 4096  ;;  %p1308_p3 = scmp.lt.s32.totalorder %s175_s22, %s1306_s30 }
  0x28   : > { %p1304_p2 = pneg %p1303_p0  ;;  %p1309_p6 = scmp.lt.s32.totalorder %s1307_s4, %s1300_s26 }
  0x2a   : > { %p1310_p8 = por %p1309_p6, %p1308_p3 }
  0x2c   : > { %p1311_p9 = pnand %p1310_p8, %p1304_p2 }
  0x2e   : > { %1314 = shalt.err (!%p1311_p9)
}
  0x2f   : > { %1206 = dma.hbm_to_vmem [thread:$0]  (!%p1477_p7), %s173_s12, 2048, %s175_s22, %s162_s24, %s1372_s27, %s1372_s27, %s1373_s28  }
  0x30   : > { %186 = sbr.rel (%p1437_p5) target bundleno = 281 (0x119), region = 32  ;;  %s188_s5 = sand.u32 (!%p1437_p5), 1, %s1353_s13  }
  0x31   : > { %s1066_s6 = sshll.u32 (!%p1437_p5), %s188_s5, 7  ;;  %s189_s7 = scalar_lea.sflag (!%p1437_p5), [#allocation3], %s188_s5 }
  0x32   : > { %s1491_s8 = scalar_lea.vmem (!%p1437_p5), [#allocation2], %s1066_s6 }
  0x35   : > { %1340 = dma.done.wait (%p1433_p4), %s189_s7, 2048  }
  0x36   : > { %1342 = vsyncadd (%p1433_p4), %s189_s7, 4294965248 }
  0x37   : > { %1344 = dma.done.wait (%p1425_p1), [#allocation5], 2048  }
  0x38   : > { %1346 = vsyncadd (%p1425_p1), [#allocation5], 4294965248  ;;  %v243_v0 = vld [vmem:[#allocation4 + $0x18] sm:$0xff]  ;;  %v237_v1 = vld [vmem:[#allocation4 + $0x8] sm:$0xff]  ;;  %vm244_vm0 = vcmask 130048   ;;  %p225_p1 = scmp.lt.s32.totalorder %s1361_s15, 1 }
  0x39   : > { %v242_v2 = vld [vmem:[#allocation4 + $0x10] sm:$0xff]  ;;  %1137 = vmatprep.subr.mxu0 %v243_v0  ;;  %1144 = vmatprep.subr.mxu1 %v237_v1  ;;  %v236_v3 = vld [vmem:[#allocation4] sm:$0xff]  ;;  %v1071_v6 = vld [vmem:[%s1491_s8 + $0x18] sm:$0xff] }
  0x3a   : > { %v1070_v4 = vld [vmem:[%s1491_s8 + $0x10] sm:$0xff]  ;;  %1138 = vmatpush3.msra.mxu0 %v243_v0  ;;  %1145 = vmatpush3.msra.mxu1 %v237_v1  ;;  %v234_v5 = vld [vmem:[%s1491_s8] sm:$0xff]  ;;  %v235_v7 = vld [vmem:[%s1491_s8 + $0x8] sm:$0xff]  ;;  %s1576_s15 = smov (!%p225_p1, %s1361_s15), 1 }
  0x3b   : > { %1139 = vmatprep.subr.mxu0 %v242_v2  ;;  %1146 = vmatprep.subr.mxu1 %v236_v3  ;;  %v412_v8 = vld [vmem:[#allocation4 + $0x28] sm:$0xff]  ;;  %v501_v9 = vld [vmem:[#allocation4 + $0x38] sm:$0xff]  ;;  %v411_v10 = vld [vmem:[#allocation4 + $0x20] sm:$0xff]  ;;  %s1104_s19 = sshll.u32 %s1576_s15, 4 }
  0x3c   : > { %1140 = vmatpush3.msra.mxu0 %v242_v2  ;;  %1141 = vmatprep.mubr.msk.f32.mxu0 %vm244_vm0, %v1070_v4  ;;  %v1076_v11 = vld [vmem:[%s1491_s8 + $0x20] sm:$0xff]  ;;  %v500_v12 = vld [vmem:[#allocation4 + $0x30] sm:$0xff]  ;;  %v1077_v13 = vld [vmem:[%s1491_s8 + $0x28] sm:$0xff]  ;;  %s232_s10 = scalar_lea.vmem %s1562_s3, %s1104_s19 }
  0x3d   : > { %1147 = vmatpush3.msra.mxu1 %v236_v3  ;;  %1148 = vmatprep.mubr.msk.f32.mxu1 %vm244_vm0, %v234_v5  ;;  %v1080_v14 = vld [vmem:[%s1491_s8 + $0x30] sm:$0xff]  ;;  %v590_v15 = vld [vmem:[#allocation4 + $0x48] sm:$0xff]  ;;  %v1081_v16 = vld [vmem:[%s1491_s8 + $0x38] sm:$0xff] }
  0x3e   : > { %1142 = vmatmul.mubr.msk.f32.vlgmr.msra.gmra.mxu0 %vm244_vm0, %v1071_v6  ;;  %1149 = vmatmul.mubr.msk.f32.vlgmr.msra.gmra.mxu1 %vm244_vm0, %v235_v7  ;;  %v679_v17 = vld [vmem:[#allocation4 + $0x58] sm:$0xff]  ;;  %v589_v18 = vld [vmem:[#allocation4 + $0x40] sm:$0xff]  ;;  %v678_v20 = vld [vmem:[#allocation4 + $0x50] sm:$0xff] }
  0x3f   : > { %1151 = vmatprep.subr.mxu0 %v412_v8  ;;  %1158 = vmatprep.subr.mxu1 %v501_v9  ;;  %v1084_v19 = vld [vmem:[%s1491_s8 + $0x40] sm:$0xff]  ;;  %v1085_v21 = vld [vmem:[%s1491_s8 + $0x48] sm:$0xff]  ;;  %v1088_v22 = vld [vmem:[%s1491_s8 + $0x50] sm:$0xff] }
  0x40   : > { %1152 = vmatpush3.msra.mxu0 %v412_v8  ;;  %1159 = vmatpush3.msra.mxu1 %v501_v9  ;;  %v768_v23 = vld [vmem:[#allocation4 + $0x68] sm:$0xff]  ;;  %v1089_v24 = vld [vmem:[%s1491_s8 + $0x58] sm:$0xff]  ;;  %v767_v26 = vld [vmem:[#allocation4 + $0x60] sm:$0xff] }
  0x41   : > { %1153 = vmatprep.subr.mxu0 %v411_v10  ;;  %1155 = vmatprep.mubr.msk.f32.mxu0 %vm244_vm0, %v1076_v11  ;;  %v857_v25 = vld [vmem:[#allocation4 + $0x78] sm:$0xff]  ;;  %v1092_v27 = vld [vmem:[%s1491_s8 + $0x60] sm:$0xff]  ;;  %v856_v28 = vld [vmem:[#allocation4 + $0x70] sm:$0xff] }
  0x42   : > { %1154 = vmatpush3.msra.mxu0 %v411_v10  ;;  %1160 = vmatprep.subr.mxu1 %v500_v12  ;;  %v1093_v29 = vld [vmem:[%s1491_s8 + $0x68] sm:$0xff]  ;;  %v1096_v30 = vld [vmem:[%s1491_s8 + $0x70] sm:$0xff]  ;;  %v1097_v31 = vld [vmem:[%s1491_s8 + $0x78] sm:$0xff] }
  0x43   : > { %1156 = vmatmul.mubr.msk.f32.vlgmr.msra.gmra.mxu0 %vm244_vm0, %v1077_v13  ;;  %1161 = vmatpush3.msra.mxu1 %v500_v12  ;;  %v1100_v57 = vld [vmem:[%s1561_s2] ss:$0 sm:$0xff] }
  0x44   : > { %1162 = vmatprep.mubr.msk.f32.mxu1 %vm244_vm0, %v1080_v14  ;;  %1165 = vmatprep.subr.mxu0 %v590_v15 }
  0x45   : > { %1163 = vmatmul.mubr.msk.f32.vlgmr.msra.gmra.mxu1 %vm244_vm0, %v1081_v16  ;;  %1166 = vmatpush3.msra.mxu0 %v590_v15 }
  0x46   : > { %1172 = vmatprep.subr.mxu1 %v679_v17  ;;  %1167 = vmatprep.subr.mxu0 %v589_v18 }
  0x47   : > { %1173 = vmatpush3.msra.mxu1 %v679_v17  ;;  %1168 = vmatpush3.msra.mxu0 %v589_v18 }
  0x48   : > { %1169 = vmatprep.mubr.msk.f32.mxu0 %vm244_vm0, %v1084_v19  ;;  %1174 = vmatprep.subr.mxu1 %v678_v20 }
  0x49   : > { %1170 = vmatmul.mubr.msk.f32.vlgmr.msra.gmra.mxu0 %vm244_vm0, %v1085_v21  ;;  %1175 = vmatpush3.msra.mxu1 %v678_v20 }
  0x4a   : > { %1176 = vmatprep.mubr.msk.f32.mxu1 %vm244_vm0, %v1088_v22  ;;  %1179 = vmatprep.subr.mxu0 %v768_v23 }
  0x4b   : > { %1177 = vmatmul.mubr.msk.f32.vlgmr.msra.gmra.mxu1 %vm244_vm0, %v1089_v24  ;;  %1180 = vmatpush3.msra.mxu0 %v768_v23 }
  0x4c   : > { %1186 = vmatprep.subr.mxu1 %v857_v25  ;;  %1181 = vmatprep.subr.mxu0 %v767_v26 }
  0x4d   : > { %1187 = vmatpush3.msra.mxu1 %v857_v25  ;;  %1182 = vmatpush3.msra.mxu0 %v767_v26 }
  0x4e   : > { %1183 = vmatprep.mubr.msk.f32.mxu0 %vm244_vm0, %v1092_v27  ;;  %1188 = vmatprep.subr.mxu1 %v856_v28 }
  0x4f   : > { %1184 = vmatmul.mubr.msk.f32.vlgmr.msra.gmra.mxu0 %vm244_vm0, %v1093_v29  ;;  %1189 = vmatpush3.msra.mxu1 %v856_v28 }
  0x50   : > { %1190 = vmatprep.mubr.msk.f32.mxu1 %vm244_vm0, %v1096_v30 }
  0x51   : > { %1191 = vmatmul.mubr.msk.f32.vlgmr.msra.gmra.mxu1 %vm244_vm0, %v1097_v31 }
  0xfe   : > { %v1143_v32 = vpop.f32.mrf.mxu0  ;;  %v1150_v33 = vpop.f32.mrf.mxu1 }
  0xff   : > { %v404_v36 = vadd.f32 %v1150_v33, %v1143_v32 }
 0x100   : > { %v317_v34 = vpop.f32.mrf.mxu0  ;;  %v398_v35 = vpop.f32.mrf.mxu1 }
 0x101   : > { %v399_v38 = vadd.f32 %v398_v35, %v317_v34 }
 0x103   : > { %v1157_v37 = vpop.f32.mrf.mxu0 }
 0x104   : > { %v495_v39 = vadd.f32 %v1157_v37, %v404_v36 }
 0x105   : > { %v1164_v40 = vpop.f32.mrf.mxu1  ;;  %v485_v41 = vpop.f32.mrf.mxu0 }
 0x106   : > { %v584_v42 = vadd.f32 %v1164_v40, %v495_v39  ;;  %v494_v43 = vadd.f32 %v485_v41, %v399_v38 }
 0x107   : > { %v574_v44 = vpop.f32.mrf.mxu1 }
 0x108   : > { %v583_v45 = vadd.f32 %v574_v44, %v494_v43 }
 0x109   : > { %v1171_v46 = vpop.f32.mrf.mxu0 }
 0x10a   : > { %v673_v47 = vadd.f32 %v1171_v46, %v584_v42 }
 0x10b   : > { %v1178_v48 = vpop.f32.mrf.mxu1  ;;  %v663_v49 = vpop.f32.mrf.mxu0 }
 0x10c   : > { %v762_v50 = vadd.f32 %v1178_v48, %v673_v47  ;;  %v672_v51 = vadd.f32 %v663_v49, %v583_v45 }
 0x10d   : > { %v752_v52 = vpop.f32.mrf.mxu1 }
 0x10e   : > { %v761_v53 = vadd.f32 %v752_v52, %v672_v51 }
 0x10f   : > { %v1185_v54 = vpop.f32.mrf.mxu0 }
 0x110   : > { %v851_v55 = vadd.f32 %v1185_v54, %v762_v50 }
 0x111   : > { %v1192_v56 = vpop.f32.mrf.mxu1  ;;  %v841_v58 = vpop.f32.mrf.mxu0 }
 0x112   : > { %v940_v59 = vadd.f32 %v1192_v56, %v851_v55  ;;  %v850_v60 = vadd.f32 %v841_v58, %v761_v53 }
 0x113   : > { %v930_v61 = vpop.f32.mrf.mxu1 }
 0x114   : > { %v949_v62 = vadd.f32 %v1100_v57, %v940_v59  ;;  %v939_v63 = vadd.f32 %v930_v61, %v850_v60 }
 0x116   : > { %951 = vst [vmem:[%s232_s10 + $0x8] sm:$0xff] %v949_v62  ;;  %v948_v0 = vadd.f32 %v1100_v57, %v939_v63 }
 0x118   : > { %950 = vst [vmem:[%s232_s10] sm:$0xff] %v948_v0 }
 0x119 PF: > { %s17_s17 = sadd.s32 1, %s1369_s17   ;;  %s1568_s12 = smov %s1353_s13 }
 0x11a   : > { %p14_p4 = scmp.ge.s32.totalorder %s17_s17, 4   ;;  %s1569_s13 = smov %s1357_s14 }
 0x11b   : > { %s1570_s14 = smov %s1472_s9  ;;  %s1571_s15 = smov %s1365_s16 }
 0x11c   : > { %s1572_s16 = smov %s1574_s25  ;;  %16 = sbr.rel (!%p14_p4) target bundleno = 5 (0x5), region = 90 }
 0x121   :  { %982 = vsyncpa [#allocation3], 1 }
 0x122   :  { %984 = vsyncpa [#allocation3 + $0x1], 1 }
 0x123   :  { %985 = vsyncpa [#allocation5], 1 }

</bundles_post_ra>
